<compile_context>
chip_gen: v6e
topology: v6e:2x2x1
jax: 0.10.0
libtpu: 0.0.40
codegen_flags: <defaults>
</compile_context>

<pallas_src>
import functools

import jax
import jax.numpy as jnp
from jax.experimental import pallas as pl
from jax.experimental.pallas import tpu as pltpu


def _round_up(x, m):
    return (x + m - 1) // m * m


def _corner_terms(pos, dims):
    """Trilinear corner (flat index, weight) pairs for grid-space coords.

    pos:  (N, 3) float32 grid-space coordinates (x, y, z), already
          un-normalized with align_corners=True.
    dims: (W, H, D) Python ints.

    Returns a list of 8 ((N, 1) int32 clipped flat index, (N, 1) f32 weight)
    pairs, z-major / x-minor.  Out-of-bounds corners get weight 0
    (padding_mode='zeros').  Uses only Python-scalar constants so the same
    code traces both inside the Pallas kernel (weights) and in the host
    wrapper (indices), guaranteeing a consistent floor().
    """
    W, H, D = dims
    per_axis = []
    for ax, size in enumerate((W, H, D)):
        p = pos[:, ax:ax + 1]                                  # (N, 1) f32
        f = jnp.floor(p)
        t = p - f
        i0 = f.astype(jnp.int32)
        i1 = i0 + 1
        lo = (jnp.clip(i0, 0, size - 1), 1.0 - t, (i0 >= 0) & (i0 < size))
        hi = (jnp.clip(i1, 0, size - 1), t, (i1 >= 0) & (i1 < size))
        per_axis.append((lo, hi))
    xs, ys, zs = per_axis

    corners = []
    for zi, wz, vz in zs:
        for yi, wy, vy in ys:
            for xi, wx, vx in xs:
                flat = (zi * H + yi) * W + xi                  # (N, 1) int32
                w = jnp.where(vx & vy & vz, wx * wy * wz, 0.0)  # (N, 1) f32
                corners.append((flat, w))
    return corners


def _dense_grid_kernel(idx_ref, pos_ref, grid_hbm, out_ref,
                       tbl_ref, gath_ref, sem,
                       *, dims, channels, tm):
    C = channels

    # One-time HBM -> VMEM copy of the whole (nvox, C) voxel table.
    # Single-buffered: the scratch persists across grid steps.  The grid axis
    # is marked "arbitrary" so every step runs on the core that filled it.
    @pl.when(pl.program_id(0) == 0)
    def _():
        cp = pltpu.make_async_copy(grid_hbm, tbl_ref, sem.at[0])
        cp.start()
        cp.wait()

    # Vectorized trilinear corner weights for this query tile (VPU).
    corners = _corner_terms(pos_ref[...], dims)   # 8 x ((TM,1) idx, (TM,1) w)

    # Gather the 8 corner rows per query from the VMEM table, addressed by
    # the scalar-prefetched flat indices (SMEM).
    base = pl.program_id(0) * tm

    @pl.loop(0, tm)
    def _(m):
        q = (base + m) * 8
        for j in range(8):
            row = tbl_ref[pl.ds(idx_ref[q + j], 1), :]         # (1, C)
            gath_ref[j, pl.ds(m, 1), :] = row

    # Weighted sum on the VPU: out[m, :] = sum_j w_j[m] * corner_row_j[m, :]
    acc = corners[0][1] * gath_ref[0]
    for j in range(1, 8):
        acc = acc + corners[j][1] * gath_ref[j]
    out_ref[...] = acc.astype(out_ref.dtype)


def dense_grid_forward(xyz, grid_param, xyz_min, xyz_max, *, tm=256):
    """Pallas equivalent of DenseGrid.forward.

    xyz:        (..., 3) float global coordinates.
    grid_param: (1, C, D, H, W) float voxel grid (PyTorch NCDHW layout,
                D/H/W = world_size[::-1]).
    """
    _, C, D, H, W = grid_param.shape
    nvox = D * H * W
    dims = (W, H, D)
    mn = tuple(float(v) for v in xyz_min)
    mx = tuple(float(v) for v in xyz_max)

    shape = xyz.shape[:-1]
    xyz_flat = xyz.reshape(-1, 3).astype(jnp.float32)
    M = xyz_flat.shape[0]

    # Tile size: multiple of 8, no larger than needed for small M.
    tm_eff = max(8, min(tm, _round_up(M, 8)))
    m_pad = _round_up(M, tm_eff)

    # Grid-space coordinates (align_corners=True un-normalization), computed
    # once so that the flat indices (host side) and the trilinear weights
    # (kernel side) are derived from exactly the same f32 values.
    pos_cols = []
    for ax, size in enumerate(dims):
        u = (xyz_flat[:, ax:ax + 1] - mn[ax]) / (mx[ax] - mn[ax]) * 2.0 - 1.0
        pos_cols.append((u + 1.0) * 0.5 * (size - 1.0))
    pos = jnp.concatenate(pos_cols, axis=1)                      # (M, 3)
    pos_p = jnp.zeros((m_pad, 3), jnp.float32).at[:M].set(pos)

    # Flat corner indices -> scalar-prefetched into SMEM, (m_pad*8,) int32,
    # laid out as [query-major, corner-minor].
    idx8 = jnp.concatenate([c[0] for c in _corner_terms(pos_p, dims)], axis=1)
    idx_flat = idx8.reshape(-1).astype(jnp.int32)

    # Voxel table (nvox, C), row index = z*H*W + y*W + x.
    grid_tbl = grid_param.reshape(C, nvox).T.astype(jnp.float32)

    # VMEM budget: single-buffered table + gather scratch + pipelined
    # pos/out blocks, padded to the (8, 128) tile grain.
    def tile_bytes(r, c):
        return _round_up(r, 8) * _round_up(c, 128) * 4

    vmem_bytes = (tile_bytes(nvox, C)                # table scratch (1x)
                  + 8 * tile_bytes(tm_eff, C)        # gathered corner planes
                  + 2 * tile_bytes(tm_eff, 3)        # pos blocks (2x pipelined)
                  + 2 * tile_bytes(tm_eff, C)        # out blocks (2x pipelined)
                  + (4 << 20))                       # headroom for temporaries
    vmem_limit = min(max(vmem_bytes, 16 << 20), 64 << 20)   # <= v7x physical

    kernel = functools.partial(
        _dense_grid_kernel, dims=dims, channels=C, tm=tm_eff)

    out = pl.pallas_call(
        kernel,
        out_shape=jax.ShapeDtypeStruct((m_pad, C), jnp.float32),
        grid_spec=pltpu.PrefetchScalarGridSpec(
            num_scalar_prefetch=1,
            grid=(m_pad // tm_eff,),
            in_specs=[
                pl.BlockSpec((tm_eff, 3), lambda i, idx: (i, 0)),
                pl.BlockSpec(memory_space=pl.ANY),    # voxel table stays in HBM
            ],
            out_specs=pl.BlockSpec((tm_eff, C), lambda i, idx: (i, 0)),
            scratch_shapes=[
                pltpu.VMEM((nvox, C), jnp.float32),        # single-buffered table
                pltpu.VMEM((8, tm_eff, C), jnp.float32),   # gathered corner rows
                pltpu.SemaphoreType.DMA((1,)),
            ],
        ),
        compiler_params=pltpu.CompilerParams(
            # "arbitrary": step 0 fills the shared table scratch that all later
            # steps read, so this axis must not be sharded across cores.
            dimension_semantics=("arbitrary",),
            vmem_limit_bytes=vmem_limit,
        ),
    )(idx_flat, pos_p, grid_tbl)

    return out[:M].reshape(*shape, C)


def dense_grid_reference(xyz, grid_param, xyz_min, xyz_max):
    """Pure-JAX reference of F.grid_sample(trilinear, align_corners=True, zeros)."""
    _, C, D, H, W = grid_param.shape
    shape = xyz.shape[:-1]
    p = xyz.reshape(-1, 3).astype(jnp.float32)
    mn = jnp.asarray(xyz_min, jnp.float32)
    mx = jnp.asarray(xyz_max, jnp.float32)
    u = (p - mn) / (mx - mn) * 2.0 - 1.0
    sizes = jnp.asarray([W, H, D], jnp.float32)
    pos = (u + 1.0) * 0.5 * (sizes - 1.0)
    i0 = jnp.floor(pos)
    t = pos - i0
    i0 = i0.astype(jnp.int32)

    g = grid_param[0]  # (C, D, H, W)

    def samp(zi, yi, xi):
        valid = (xi >= 0) & (xi < W) & (yi >= 0) & (yi < H) & (zi >= 0) & (zi < D)
        xi = jnp.clip(xi, 0, W - 1)
        yi = jnp.clip(yi, 0, H - 1)
        zi = jnp.clip(zi, 0, D - 1)
        v = g[:, zi, yi, xi]                         # (C, M)
        return jnp.where(valid[None, :], v, 0.0)

    acc = jnp.zeros((C, p.shape[0]), jnp.float32)
    for dz in (0, 1):
        wz = t[:, 2] if dz else 1.0 - t[:, 2]
        zi = i0[:, 2] + dz
        for dy in (0, 1):
            wy = t[:, 1] if dy else 1.0 - t[:, 1]
            yi = i0[:, 1] + dy
            for dx in (0, 1):
                wx = t[:, 0] if dx else 1.0 - t[:, 0]
                xi = i0[:, 0] + dx
                acc = acc + (wx * wy * wz)[None, :] * samp(zi, yi, xi)
    return acc.T.reshape(*shape, C)


if __name__ == "__main__":
    key = jax.random.PRNGKey(0)
    k_grid, k_xyz = jax.random.split(key)

    channels = 4
    world_size = (6, 5, 4)                  # (X, Y, Z) -> grid dims reversed
    xyz_min = (-1.0, -1.0, -1.0)
    xyz_max = (1.0, 1.0, 1.0)

    # nn.Parameter is zeros in __init__; use deterministic random values so
    # the kernel output is non-trivial.
    grid_param = jax.random.normal(
        k_grid, (1, channels, world_size[2], world_size[1], world_size[0]),
        dtype=jnp.float32)

    # Query points, including some slightly out of bounds (exercises the
    # zeros-padding semantics).
    xyz = jax.random.uniform(k_xyz, (2, 8, 3), jnp.float32, minval=-1.1, maxval=1.1)

    out = dense_grid_forward(xyz, grid_param, xyz_min, xyz_max)
    out = jax.block_until_ready(out)

    ref = dense_grid_reference(xyz, grid_param, xyz_min, xyz_max)
    assert out.shape == (2, 8, channels), out.shape
    err = float(jnp.max(jnp.abs(out - ref)))
    assert err < 1e-4, err

    print("KERNEL_OK")
</pallas_src>

<mosaic_0001>
module attributes {stable_mosaic.version = 11 : i64} {
  func.func @_dense_grid_kernel(%arg0: i32, %arg1: memref<128xi32, #tpu.memory_space<smem>>, %arg2: memref<16x3xf32, #tpu.memory_space<vmem>>, %arg3: memref<120x4xf32, #tpu.memory_space<any>>, %arg4: memref<16x4xf32, #tpu.memory_space<vmem>>, %arg5: memref<120x4xf32, #tpu.memory_space<vmem>>, %arg6: memref<8x16x4xf32, #tpu.memory_space<vmem>>, %arg7: memref<1x!tpu.dma_semaphore, #tpu.memory_space<semaphore_mem>>) attributes {dimension_semantics = [#tpu.dimension_semantics<arbitrary>], iteration_bounds = array<i64: 1>, scalar_prefetch = 1 : i64, scratch_operands = 3 : i64, tpu.core_type = #tpu.core_type<tc>, window_params = [{transform_indices = @transform_0, window_bounds = array<i64: 16, 3>}, {}, {transform_indices = @transform_2, window_bounds = array<i64: 16, 4>}]} {
    %c0_i32 = arith.constant 0 : i32
    %0 = arith.cmpi eq, %arg0, %c0_i32 : i32
    %1 = arith.extui %0 : i1 to i32
    %c0_i32_0 = arith.constant 0 : i32
    %2 = arith.cmpi ne, %1, %c0_i32_0 : i32
    scf.if %2 {
      %c0_i32_46 = arith.constant 0 : i32
      %148 = tpu.memref_slice %arg7[%c0_i32_46] : memref<1x!tpu.dma_semaphore, #tpu.memory_space<semaphore_mem>> -> memref<1x!tpu.dma_semaphore, #tpu.memory_space<semaphore_mem>>
      %149 = tpu.memref_squeeze %148 : memref<1x!tpu.dma_semaphore, #tpu.memory_space<semaphore_mem>> -> memref<!tpu.dma_semaphore, #tpu.memory_space<semaphore_mem>>
      tpu.enqueue_dma source(%arg3 : memref<120x4xf32, #tpu.memory_space<any>>) target(%arg5 : memref<120x4xf32, #tpu.memory_space<vmem>>) target_semaphore(%149 : memref<!tpu.dma_semaphore, #tpu.memory_space<semaphore_mem>>)
      %c0_i32_47 = arith.constant 0 : i32
      %150 = tpu.memref_slice %arg7[%c0_i32_47] : memref<1x!tpu.dma_semaphore, #tpu.memory_space<semaphore_mem>> -> memref<1x!tpu.dma_semaphore, #tpu.memory_space<semaphore_mem>>
      %151 = tpu.memref_squeeze %150 : memref<1x!tpu.dma_semaphore, #tpu.memory_space<semaphore_mem>> -> memref<!tpu.dma_semaphore, #tpu.memory_space<semaphore_mem>>
      tpu.wait_dma2 semaphore(%151 : memref<!tpu.dma_semaphore, #tpu.memory_space<semaphore_mem>>) src(%arg3 : memref<120x4xf32, #tpu.memory_space<any>>) dst(%arg5 : memref<120x4xf32, #tpu.memory_space<vmem>>)
    } else {
    }
    %c0 = arith.constant 0 : index
    %c0_1 = arith.constant 0 : index
    %3 = vector.load %arg2[%c0, %c0_1] : memref<16x3xf32, #tpu.memory_space<vmem>>, vector<16x3xf32>
    %4 = vector.extract_strided_slice %3 {offsets = [0, 0], sizes = [16, 1], strides = [1, 1]} : vector<16x3xf32> to vector<16x1xf32>
    %5 = math.floor %4 : vector<16x1xf32>
    %6 = arith.subf %4, %5 : vector<16x1xf32>
    %7 = arith.fptosi %5 : vector<16x1xf32> to vector<16x1xi32>
    %c1_i32 = arith.constant 1 : i32
    %8 = vector.broadcast %c1_i32 : i32 to vector<16x1xi32>
    %9 = arith.addi %7, %8 : vector<16x1xi32>
    %cst = arith.constant 1.000000e+00 : f32
    %10 = vector.broadcast %cst : f32 to vector<16x1xf32>
    %11 = arith.subf %10, %6 : vector<16x1xf32>
    %c0_i32_2 = arith.constant 0 : i32
    %12 = vector.broadcast %c0_i32_2 : i32 to vector<16x1xi32>
    %13 = arith.cmpi sge, %7, %12 : vector<16x1xi32>
    %c6_i32 = arith.constant 6 : i32
    %14 = vector.broadcast %c6_i32 : i32 to vector<16x1xi32>
    %15 = arith.cmpi slt, %7, %14 : vector<16x1xi32>
    %16 = arith.andi %13, %15 : vector<16x1xi1>
    %c0_i32_3 = arith.constant 0 : i32
    %17 = vector.broadcast %c0_i32_3 : i32 to vector<16x1xi32>
    %18 = arith.cmpi sge, %9, %17 : vector<16x1xi32>
    %c6_i32_4 = arith.constant 6 : i32
    %19 = vector.broadcast %c6_i32_4 : i32 to vector<16x1xi32>
    %20 = arith.cmpi slt, %9, %19 : vector<16x1xi32>
    %21 = arith.andi %18, %20 : vector<16x1xi1>
    %22 = vector.extract_strided_slice %3 {offsets = [0, 1], sizes = [16, 1], strides = [1, 1]} : vector<16x3xf32> to vector<16x1xf32>
    %23 = math.floor %22 : vector<16x1xf32>
    %24 = arith.subf %22, %23 : vector<16x1xf32>
    %25 = arith.fptosi %23 : vector<16x1xf32> to vector<16x1xi32>
    %c1_i32_5 = arith.constant 1 : i32
    %26 = vector.broadcast %c1_i32_5 : i32 to vector<16x1xi32>
    %27 = arith.addi %25, %26 : vector<16x1xi32>
    %cst_6 = arith.constant 1.000000e+00 : f32
    %28 = vector.broadcast %cst_6 : f32 to vector<16x1xf32>
    %29 = arith.subf %28, %24 : vector<16x1xf32>
    %c0_i32_7 = arith.constant 0 : i32
    %30 = vector.broadcast %c0_i32_7 : i32 to vector<16x1xi32>
    %31 = arith.cmpi sge, %25, %30 : vector<16x1xi32>
    %c5_i32 = arith.constant 5 : i32
    %32 = vector.broadcast %c5_i32 : i32 to vector<16x1xi32>
    %33 = arith.cmpi slt, %25, %32 : vector<16x1xi32>
    %34 = arith.andi %31, %33 : vector<16x1xi1>
    %c0_i32_8 = arith.constant 0 : i32
    %35 = vector.broadcast %c0_i32_8 : i32 to vector<16x1xi32>
    %36 = arith.cmpi sge, %27, %35 : vector<16x1xi32>
    %c5_i32_9 = arith.constant 5 : i32
    %37 = vector.broadcast %c5_i32_9 : i32 to vector<16x1xi32>
    %38 = arith.cmpi slt, %27, %37 : vector<16x1xi32>
    %39 = arith.andi %36, %38 : vector<16x1xi1>
    %40 = vector.extract_strided_slice %3 {offsets = [0, 2], sizes = [16, 1], strides = [1, 1]} : vector<16x3xf32> to vector<16x1xf32>
    %41 = math.floor %40 : vector<16x1xf32>
    %42 = arith.subf %40, %41 : vector<16x1xf32>
    %43 = arith.fptosi %41 : vector<16x1xf32> to vector<16x1xi32>
    %c1_i32_10 = arith.constant 1 : i32
    %44 = vector.broadcast %c1_i32_10 : i32 to vector<16x1xi32>
    %45 = arith.addi %43, %44 : vector<16x1xi32>
    %cst_11 = arith.constant 1.000000e+00 : f32
    %46 = vector.broadcast %cst_11 : f32 to vector<16x1xf32>
    %47 = arith.subf %46, %42 : vector<16x1xf32>
    %c0_i32_12 = arith.constant 0 : i32
    %48 = vector.broadcast %c0_i32_12 : i32 to vector<16x1xi32>
    %49 = arith.cmpi sge, %43, %48 : vector<16x1xi32>
    %c4_i32 = arith.constant 4 : i32
    %50 = vector.broadcast %c4_i32 : i32 to vector<16x1xi32>
    %51 = arith.cmpi slt, %43, %50 : vector<16x1xi32>
    %52 = arith.andi %49, %51 : vector<16x1xi1>
    %c0_i32_13 = arith.constant 0 : i32
    %53 = vector.broadcast %c0_i32_13 : i32 to vector<16x1xi32>
    %54 = arith.cmpi sge, %45, %53 : vector<16x1xi32>
    %c4_i32_14 = arith.constant 4 : i32
    %55 = vector.broadcast %c4_i32_14 : i32 to vector<16x1xi32>
    %56 = arith.cmpi slt, %45, %55 : vector<16x1xi32>
    %57 = arith.andi %54, %56 : vector<16x1xi1>
    %58 = arith.andi %16, %34 : vector<16x1xi1>
    %59 = arith.andi %58, %52 : vector<16x1xi1>
    %60 = arith.mulf %11, %29 : vector<16x1xf32>
    %61 = arith.mulf %60, %47 : vector<16x1xf32>
    %cst_15 = arith.constant 0.000000e+00 : f32
    %62 = vector.broadcast %cst_15 : f32 to vector<16x1xf32>
    %63 = arith.select %59, %61, %62 : vector<16x1xi1>, vector<16x1xf32>
    %64 = arith.andi %21, %34 : vector<16x1xi1>
    %65 = arith.andi %64, %52 : vector<16x1xi1>
    %66 = arith.mulf %6, %29 : vector<16x1xf32>
    %67 = arith.mulf %66, %47 : vector<16x1xf32>
    %cst_16 = arith.constant 0.000000e+00 : f32
    %68 = vector.broadcast %cst_16 : f32 to vector<16x1xf32>
    %69 = arith.select %65, %67, %68 : vector<16x1xi1>, vector<16x1xf32>
    %70 = arith.andi %16, %39 : vector<16x1xi1>
    %71 = arith.andi %70, %52 : vector<16x1xi1>
    %72 = arith.mulf %11, %24 : vector<16x1xf32>
    %73 = arith.mulf %72, %47 : vector<16x1xf32>
    %cst_17 = arith.constant 0.000000e+00 : f32
    %74 = vector.broadcast %cst_17 : f32 to vector<16x1xf32>
    %75 = arith.select %71, %73, %74 : vector<16x1xi1>, vector<16x1xf32>
    %76 = arith.andi %21, %39 : vector<16x1xi1>
    %77 = arith.andi %76, %52 : vector<16x1xi1>
    %78 = arith.mulf %6, %24 : vector<16x1xf32>
    %79 = arith.mulf %78, %47 : vector<16x1xf32>
    %cst_18 = arith.constant 0.000000e+00 : f32
    %80 = vector.broadcast %cst_18 : f32 to vector<16x1xf32>
    %81 = arith.select %77, %79, %80 : vector<16x1xi1>, vector<16x1xf32>
    %82 = arith.andi %16, %34 : vector<16x1xi1>
    %83 = arith.andi %82, %57 : vector<16x1xi1>
    %84 = arith.mulf %11, %29 : vector<16x1xf32>
    %85 = arith.mulf %84, %42 : vector<16x1xf32>
    %cst_19 = arith.constant 0.000000e+00 : f32
    %86 = vector.broadcast %cst_19 : f32 to vector<16x1xf32>
    %87 = arith.select %83, %85, %86 : vector<16x1xi1>, vector<16x1xf32>
    %88 = arith.andi %21, %34 : vector<16x1xi1>
    %89 = arith.andi %88, %57 : vector<16x1xi1>
    %90 = arith.mulf %6, %29 : vector<16x1xf32>
    %91 = arith.mulf %90, %42 : vector<16x1xf32>
    %cst_20 = arith.constant 0.000000e+00 : f32
    %92 = vector.broadcast %cst_20 : f32 to vector<16x1xf32>
    %93 = arith.select %89, %91, %92 : vector<16x1xi1>, vector<16x1xf32>
    %94 = arith.andi %16, %39 : vector<16x1xi1>
    %95 = arith.andi %94, %57 : vector<16x1xi1>
    %96 = arith.mulf %11, %24 : vector<16x1xf32>
    %97 = arith.mulf %96, %42 : vector<16x1xf32>
    %cst_21 = arith.constant 0.000000e+00 : f32
    %98 = vector.broadcast %cst_21 : f32 to vector<16x1xf32>
    %99 = arith.select %95, %97, %98 : vector<16x1xi1>, vector<16x1xf32>
    %100 = arith.andi %21, %39 : vector<16x1xi1>
    %101 = arith.andi %100, %57 : vector<16x1xi1>
    %102 = arith.mulf %6, %24 : vector<16x1xf32>
    %103 = arith.mulf %102, %42 : vector<16x1xf32>
    %cst_22 = arith.constant 0.000000e+00 : f32
    %104 = vector.broadcast %cst_22 : f32 to vector<16x1xf32>
    %105 = arith.select %101, %103, %104 : vector<16x1xi1>, vector<16x1xf32>
    %c16_i32 = arith.constant 16 : i32
    %106 = arith.muli %arg0, %c16_i32 : i32
    %c0_i32_23 = arith.constant 0 : i32
    %c16_i32_24 = arith.constant 16 : i32
    %107 = arith.addi %c0_i32_23, %c16_i32_24 : i32
    %c1_i32_25 = arith.constant 1 : i32
    scf.for %arg8 = %c0_i32_23 to %107 step %c1_i32_25  : i32 {
      %c1_i32_46 = arith.constant 1 : i32
      %148 = arith.muli %arg8, %c1_i32_46 : i32
      %c0_i32_47 = arith.constant 0 : i32
      %149 = arith.addi %c0_i32_47, %148 : i32
      %150 = arith.addi %106, %149 : i32
      %c8_i32 = arith.constant 8 : i32
      %151 = arith.muli %150, %c8_i32 : i32
      %c0_i32_48 = arith.constant 0 : i32
      %152 = arith.addi %151, %c0_i32_48 : i32
      %153 = arith.index_cast %152 : i32 to index
      %154 = memref.load %arg1[%153] : memref<128xi32, #tpu.memory_space<smem>>
      %155 = arith.index_cast %154 : i32 to index
      %c0_49 = arith.constant 0 : index
      %156 = vector.load %arg5[%155, %c0_49] : memref<120x4xf32, #tpu.memory_space<vmem>>, vector<1x4xf32>
      %c0_50 = arith.constant 0 : index
      %157 = arith.index_cast %149 : i32 to index
      %c0_51 = arith.constant 0 : index
      %158 = vector.load %arg6[%c0_50, %157, %c0_51] : memref<8x16x4xf32, #tpu.memory_space<vmem>>, vector<1x1x4xf32>
      %159 = vector.shape_cast %158 : vector<1x1x4xf32> to vector<1x4xf32>
      %160 = vector.shape_cast %156 : vector<1x4xf32> to vector<1x1x4xf32>
      tpu.vector_store %arg6[%c0_50, %157, %c0_51], %160 {strides = array<i32>} : memref<8x16x4xf32, #tpu.memory_space<vmem>>, vector<1x1x4xf32>,
      %c1_i32_52 = arith.constant 1 : i32
      %161 = arith.addi %151, %c1_i32_52 : i32
      %162 = arith.index_cast %161 : i32 to index
      %163 = memref.load %arg1[%162] : memref<128xi32, #tpu.memory_space<smem>>
      %164 = arith.index_cast %163 : i32 to index
      %c0_53 = arith.constant 0 : index
      %165 = vector.load %arg5[%164, %c0_53] : memref<120x4xf32, #tpu.memory_space<vmem>>, vector<1x4xf32>
      %c1_54 = arith.constant 1 : index
      %166 = arith.index_cast %149 : i32 to index
      %c0_55 = arith.constant 0 : index
      %167 = vector.load %arg6[%c1_54, %166, %c0_55] : memref<8x16x4xf32, #tpu.memory_space<vmem>>, vector<1x1x4xf32>
      %168 = vector.shape_cast %167 : vector<1x1x4xf32> to vector<1x4xf32>
      %169 = vector.shape_cast %165 : vector<1x4xf32> to vector<1x1x4xf32>
      tpu.vector_store %arg6[%c1_54, %166, %c0_55], %169 {strides = array<i32>} : memref<8x16x4xf32, #tpu.memory_space<vmem>>, vector<1x1x4xf32>,
      %c2_i32 = arith.constant 2 : i32
      %170 = arith.addi %151, %c2_i32 : i32
      %171 = arith.index_cast %170 : i32 to index
      %172 = memref.load %arg1[%171] : memref<128xi32, #tpu.memory_space<smem>>
      %173 = arith.index_cast %172 : i32 to index
      %c0_56 = arith.constant 0 : index
      %174 = vector.load %arg5[%173, %c0_56] : memref<120x4xf32, #tpu.memory_space<vmem>>, vector<1x4xf32>
      %c2_57 = arith.constant 2 : index
      %175 = arith.index_cast %149 : i32 to index
      %c0_58 = arith.constant 0 : index
      %176 = vector.load %arg6[%c2_57, %175, %c0_58] : memref<8x16x4xf32, #tpu.memory_space<vmem>>, vector<1x1x4xf32>
      %177 = vector.shape_cast %176 : vector<1x1x4xf32> to vector<1x4xf32>
      %178 = vector.shape_cast %174 : vector<1x4xf32> to vector<1x1x4xf32>
      tpu.vector_store %arg6[%c2_57, %175, %c0_58], %178 {strides = array<i32>} : memref<8x16x4xf32, #tpu.memory_space<vmem>>, vector<1x1x4xf32>,
      %c3_i32 = arith.constant 3 : i32
      %179 = arith.addi %151, %c3_i32 : i32
      %180 = arith.index_cast %179 : i32 to index
      %181 = memref.load %arg1[%180] : memref<128xi32, #tpu.memory_space<smem>>
      %182 = arith.index_cast %181 : i32 to index
      %c0_59 = arith.constant 0 : index
      %183 = vector.load %arg5[%182, %c0_59] : memref<120x4xf32, #tpu.memory_space<vmem>>, vector<1x4xf32>
      %c3_60 = arith.constant 3 : index
      %184 = arith.index_cast %149 : i32 to index
      %c0_61 = arith.constant 0 : index
      %185 = vector.load %arg6[%c3_60, %184, %c0_61] : memref<8x16x4xf32, #tpu.memory_space<vmem>>, vector<1x1x4xf32>
      %186 = vector.shape_cast %185 : vector<1x1x4xf32> to vector<1x4xf32>
      %187 = vector.shape_cast %183 : vector<1x4xf32> to vector<1x1x4xf32>
      tpu.vector_store %arg6[%c3_60, %184, %c0_61], %187 {strides = array<i32>} : memref<8x16x4xf32, #tpu.memory_space<vmem>>, vector<1x1x4xf32>,
      %c4_i32_62 = arith.constant 4 : i32
      %188 = arith.addi %151, %c4_i32_62 : i32
      %189 = arith.index_cast %188 : i32 to index
      %190 = memref.load %arg1[%189] : memref<128xi32, #tpu.memory_space<smem>>
      %191 = arith.index_cast %190 : i32 to index
      %c0_63 = arith.constant 0 : index
      %192 = vector.load %arg5[%191, %c0_63] : memref<120x4xf32, #tpu.memory_space<vmem>>, vector<1x4xf32>
      %c4_64 = arith.constant 4 : index
      %193 = arith.index_cast %149 : i32 to index
      %c0_65 = arith.constant 0 : index
      %194 = vector.load %arg6[%c4_64, %193, %c0_65] : memref<8x16x4xf32, #tpu.memory_space<vmem>>, vector<1x1x4xf32>
      %195 = vector.shape_cast %194 : vector<1x1x4xf32> to vector<1x4xf32>
      %196 = vector.shape_cast %192 : vector<1x4xf32> to vector<1x1x4xf32>
      tpu.vector_store %arg6[%c4_64, %193, %c0_65], %196 {strides = array<i32>} : memref<8x16x4xf32, #tpu.memory_space<vmem>>, vector<1x1x4xf32>,
      %c5_i32_66 = arith.constant 5 : i32
      %197 = arith.addi %151, %c5_i32_66 : i32
      %198 = arith.index_cast %197 : i32 to index
      %199 = memref.load %arg1[%198] : memref<128xi32, #tpu.memory_space<smem>>
      %200 = arith.index_cast %199 : i32 to index
      %c0_67 = arith.constant 0 : index
      %201 = vector.load %arg5[%200, %c0_67] : memref<120x4xf32, #tpu.memory_space<vmem>>, vector<1x4xf32>
      %c5_68 = arith.constant 5 : index
      %202 = arith.index_cast %149 : i32 to index
      %c0_69 = arith.constant 0 : index
      %203 = vector.load %arg6[%c5_68, %202, %c0_69] : memref<8x16x4xf32, #tpu.memory_space<vmem>>, vector<1x1x4xf32>
      %204 = vector.shape_cast %203 : vector<1x1x4xf32> to vector<1x4xf32>
      %205 = vector.shape_cast %201 : vector<1x4xf32> to vector<1x1x4xf32>
      tpu.vector_store %arg6[%c5_68, %202, %c0_69], %205 {strides = array<i32>} : memref<8x16x4xf32, #tpu.memory_space<vmem>>, vector<1x1x4xf32>,
      %c6_i32_70 = arith.constant 6 : i32
      %206 = arith.addi %151, %c6_i32_70 : i32
      %207 = arith.index_cast %206 : i32 to index
      %208 = memref.load %arg1[%207] : memref<128xi32, #tpu.memory_space<smem>>
      %209 = arith.index_cast %208 : i32 to index
      %c0_71 = arith.constant 0 : index
      %210 = vector.load %arg5[%209, %c0_71] : memref<120x4xf32, #tpu.memory_space<vmem>>, vector<1x4xf32>
      %c6_72 = arith.constant 6 : index
      %211 = arith.index_cast %149 : i32 to index
      %c0_73 = arith.constant 0 : index
      %212 = vector.load %arg6[%c6_72, %211, %c0_73] : memref<8x16x4xf32, #tpu.memory_space<vmem>>, vector<1x1x4xf32>
      %213 = vector.shape_cast %212 : vector<1x1x4xf32> to vector<1x4xf32>
      %214 = vector.shape_cast %210 : vector<1x4xf32> to vector<1x1x4xf32>
      tpu.vector_store %arg6[%c6_72, %211, %c0_73], %214 {strides = array<i32>} : memref<8x16x4xf32, #tpu.memory_space<vmem>>, vector<1x1x4xf32>,
      %c7_i32 = arith.constant 7 : i32
      %215 = arith.addi %151, %c7_i32 : i32
      %216 = arith.index_cast %215 : i32 to index
      %217 = memref.load %arg1[%216] : memref<128xi32, #tpu.memory_space<smem>>
      %218 = arith.index_cast %217 : i32 to index
      %c0_74 = arith.constant 0 : index
      %219 = vector.load %arg5[%218, %c0_74] : memref<120x4xf32, #tpu.memory_space<vmem>>, vector<1x4xf32>
      %c7_75 = arith.constant 7 : index
      %220 = arith.index_cast %149 : i32 to index
      %c0_76 = arith.constant 0 : index
      %221 = vector.load %arg6[%c7_75, %220, %c0_76] : memref<8x16x4xf32, #tpu.memory_space<vmem>>, vector<1x1x4xf32>
      %222 = vector.shape_cast %221 : vector<1x1x4xf32> to vector<1x4xf32>
      %223 = vector.shape_cast %219 : vector<1x4xf32> to vector<1x1x4xf32>
      tpu.vector_store %arg6[%c7_75, %220, %c0_76], %223 {strides = array<i32>} : memref<8x16x4xf32, #tpu.memory_space<vmem>>, vector<1x1x4xf32>,
    }
    %c16_i32_26 = arith.constant 16 : i32
    %c0_27 = arith.constant 0 : index
    %c0_28 = arith.constant 0 : index
    %c0_29 = arith.constant 0 : index
    %108 = vector.load %arg6[%c0_27, %c0_28, %c0_29] : memref<8x16x4xf32, #tpu.memory_space<vmem>>, vector<1x16x4xf32>
    %109 = vector.shape_cast %108 : vector<1x16x4xf32> to vector<16x4xf32>
    %110 = vector.broadcast %63 : vector<16x1xf32> to vector<16x4xf32>
    %111 = arith.mulf %110, %109 : vector<16x4xf32>
    %c1 = arith.constant 1 : index
    %c0_30 = arith.constant 0 : index
    %c0_31 = arith.constant 0 : index
    %112 = vector.load %arg6[%c1, %c0_30, %c0_31] : memref<8x16x4xf32, #tpu.memory_space<vmem>>, vector<1x16x4xf32>
    %113 = vector.shape_cast %112 : vector<1x16x4xf32> to vector<16x4xf32>
    %114 = vector.broadcast %69 : vector<16x1xf32> to vector<16x4xf32>
    %115 = arith.mulf %114, %113 : vector<16x4xf32>
    %116 = arith.addf %111, %115 : vector<16x4xf32>
    %c2 = arith.constant 2 : index
    %c0_32 = arith.constant 0 : index
    %c0_33 = arith.constant 0 : index
    %117 = vector.load %arg6[%c2, %c0_32, %c0_33] : memref<8x16x4xf32, #tpu.memory_space<vmem>>, vector<1x16x4xf32>
    %118 = vector.shape_cast %117 : vector<1x16x4xf32> to vector<16x4xf32>
    %119 = vector.broadcast %75 : vector<16x1xf32> to vector<16x4xf32>
    %120 = arith.mulf %119, %118 : vector<16x4xf32>
    %121 = arith.addf %116, %120 : vector<16x4xf32>
    %c3 = arith.constant 3 : index
    %c0_34 = arith.constant 0 : index
    %c0_35 = arith.constant 0 : index
    %122 = vector.load %arg6[%c3, %c0_34, %c0_35] : memref<8x16x4xf32, #tpu.memory_space<vmem>>, vector<1x16x4xf32>
    %123 = vector.shape_cast %122 : vector<1x16x4xf32> to vector<16x4xf32>
    %124 = vector.broadcast %81 : vector<16x1xf32> to vector<16x4xf32>
    %125 = arith.mulf %124, %123 : vector<16x4xf32>
    %126 = arith.addf %121, %125 : vector<16x4xf32>
    %c4 = arith.constant 4 : index
    %c0_36 = arith.constant 0 : index
    %c0_37 = arith.constant 0 : index
    %127 = vector.load %arg6[%c4, %c0_36, %c0_37] : memref<8x16x4xf32, #tpu.memory_space<vmem>>, vector<1x16x4xf32>
    %128 = vector.shape_cast %127 : vector<1x16x4xf32> to vector<16x4xf32>
    %129 = vector.broadcast %87 : vector<16x1xf32> to vector<16x4xf32>
    %130 = arith.mulf %129, %128 : vector<16x4xf32>
    %131 = arith.addf %126, %130 : vector<16x4xf32>
    %c5 = arith.constant 5 : index
    %c0_38 = arith.constant 0 : index
    %c0_39 = arith.constant 0 : index
    %132 = vector.load %arg6[%c5, %c0_38, %c0_39] : memref<8x16x4xf32, #tpu.memory_space<vmem>>, vector<1x16x4xf32>
    %133 = vector.shape_cast %132 : vector<1x16x4xf32> to vector<16x4xf32>
    %134 = vector.broadcast %93 : vector<16x1xf32> to vector<16x4xf32>
    %135 = arith.mulf %134, %133 : vector<16x4xf32>
    %136 = arith.addf %131, %135 : vector<16x4xf32>
    %c6 = arith.constant 6 : index
    %c0_40 = arith.constant 0 : index
    %c0_41 = arith.constant 0 : index
    %137 = vector.load %arg6[%c6, %c0_40, %c0_41] : memref<8x16x4xf32, #tpu.memory_space<vmem>>, vector<1x16x4xf32>
    %138 = vector.shape_cast %137 : vector<1x16x4xf32> to vector<16x4xf32>
    %139 = vector.broadcast %99 : vector<16x1xf32> to vector<16x4xf32>
    %140 = arith.mulf %139, %138 : vector<16x4xf32>
    %141 = arith.addf %136, %140 : vector<16x4xf32>
    %c7 = arith.constant 7 : index
    %c0_42 = arith.constant 0 : index
    %c0_43 = arith.constant 0 : index
    %142 = vector.load %arg6[%c7, %c0_42, %c0_43] : memref<8x16x4xf32, #tpu.memory_space<vmem>>, vector<1x16x4xf32>
    %143 = vector.shape_cast %142 : vector<1x16x4xf32> to vector<16x4xf32>
    %144 = vector.broadcast %105 : vector<16x1xf32> to vector<16x4xf32>
    %145 = arith.mulf %144, %143 : vector<16x4xf32>
    %146 = arith.addf %141, %145 : vector<16x4xf32>
    %c0_44 = arith.constant 0 : index
    %c0_45 = arith.constant 0 : index
    %147 = vector.load %arg4[%c0_44, %c0_45] : memref<16x4xf32, #tpu.memory_space<vmem>>, vector<16x4xf32>
    tpu.vector_store %arg4[%c0_44, %c0_45], %146 {strides = array<i32>} : memref<16x4xf32, #tpu.memory_space<vmem>>, vector<16x4xf32>,
    return
  }
  func.func @transform_0(%arg0: i32, %arg1: memref<128xi32, #tpu.memory_space<smem>>) -> (i32, i32) {
    %c0_i32 = arith.constant 0 : i32
    %c0_i32_0 = arith.constant 0 : i32
    return %arg0, %c0_i32 : i32, i32
  }
  func.func @transform_2(%arg0: i32, %arg1: memref<128xi32, #tpu.memory_space<smem>>) -> (i32, i32) {
    %c0_i32 = arith.constant 0 : i32
    %c0_i32_0 = arith.constant 0 : i32
    return %arg0, %c0_i32 : i32, i32
  }
}

</mosaic_0001>

<bundles_post_ra>
// kernel: tpu_custom_call.1
= control target key start
LH: loop header
LB: loop body
LE: loop exit
PB: predicated region body
PF: predicated region fallthrough
CT: control target
= control target key end

     0   :  { %s1031_s0 = inlined_call_operand.vmem [shape: s32[128], index: 0, kind: input, shape index: {}]   ;;  %s1032_s1 = inlined_call_operand.vmem [shape: f32[16,3], index: 1, kind: input, shape index: {}]   ;;  %s1033_s2 = inlined_call_operand.vmem [shape: f32[120,4], index: 2, kind: input, shape index: {}]   ;;  %s1034_s3 = inlined_call_operand.vmem [shape: f32[16,4], index: 3, kind: output, shape index: {}]  }
   0x1   :  { %s8_s14 = sshll.u32 %s1031_s0, 4  ;;  %s9_s14 = int_to_ptr.vmem [resolvable:$true] %s8_s14 }
   0x2   :  { %s531_s15 = scalar_lea.vmem %s9_s14, 16  ;;  %p536_p1 = scmp.lt.s32.totalorder %s9_s14, %s9_s14 }
   0x3   :  { %p532_p0 = scmp.ne.s32.totalorder %s9_s14, %s531_s15  ;;  %p537_p2 = scmp.lt.s32.totalorder %s531_s15, %s531_s15 }
   0x5   :  { %p538_p3 = por %p537_p2, %p536_p1 }
   0x7   :  { %p539_p4 = pnand %p538_p3, %p532_p0 }
   0x9   :  { %542 = shalt.err (!%p539_p4)  }
   0xa   :  { %s555_s16 = smov [#allocation6]  }
   0xb   :  { %11 = dma.vmem_to_smem %s9_s14, 16, %s555_s16, [#allocation5] }
   0xc   :  { %547 = dma.done.wait [#allocation5], 16 }
   0xd   :  { %548 = vsyncadd [#allocation5], 4294967280 }
   0xe   :  { %13 = sfence }
   0xf   :  { %v53_v0 = vld [vmem:[%s1033_s2] sm:$0xff]  ;;  %v55_v1 = vld [vmem:[%s1033_s2 + $0x8] sm:$0xff]  ;;  %v57_v2 = vld [vmem:[%s1033_s2 + $0x10] sm:$0xff] }
  0x10   :  { %54 = vst [vmem:[#allocation2] sm:$0xff] %v53_v0  ;;  %56 = vst [vmem:[#allocation2 + $0x8] sm:$0xff] %v55_v1  ;;  %v59_v3 = vld [vmem:[%s1033_s2 + $0x18] sm:$0xff]  ;;  %v61_v4 = vld [vmem:[%s1033_s2 + $0x20] sm:$0xff] }
  0x11   :  { %58 = vst [vmem:[#allocation2 + $0x10] sm:$0xff] %v57_v2  ;;  %v63_v5 = vld [vmem:[%s1033_s2 + $0x28] sm:$0xff]  ;;  %60 = vst [vmem:[#allocation2 + $0x18] sm:$0xff] %v59_v3  ;;  %v65_v6 = vld [vmem:[%s1033_s2 + $0x30] sm:$0xff] }
  0x12   :  { %62 = vst [vmem:[#allocation2 + $0x20] sm:$0xff] %v61_v4  ;;  %64 = vst [vmem:[#allocation2 + $0x28] sm:$0xff] %v63_v5  ;;  %v67_v7 = vld [vmem:[%s1033_s2 + $0x38] sm:$0xff]  ;;  %v69_v8 = vld [vmem:[%s1033_s2 + $0x40] sm:$0xff] }
  0x13   :  { %66 = vst [vmem:[#allocation2 + $0x30] sm:$0xff] %v65_v6  ;;  %68 = vst [vmem:[#allocation2 + $0x38] sm:$0xff] %v67_v7  ;;  %v71_v9 = vld [vmem:[%s1033_s2 + $0x48] sm:$0xff]  ;;  %v73_v10 = vld [vmem:[%s1033_s2 + $0x50] sm:$0xff] }
  0x14   :  { %70 = vst [vmem:[#allocation2 + $0x40] sm:$0xff] %v69_v8  ;;  %v75_v11 = vld [vmem:[%s1033_s2 + $0x58] sm:$0xff]  ;;  %72 = vst [vmem:[#allocation2 + $0x48] sm:$0xff] %v71_v9  ;;  %v77_v12 = vld [vmem:[%s1033_s2 + $0x60] sm:$0xff] }
  0x15   :  { %74 = vst [vmem:[#allocation2 + $0x50] sm:$0xff] %v73_v10  ;;  %76 = vst [vmem:[#allocation2 + $0x58] sm:$0xff] %v75_v11  ;;  %v79_v13 = vld [vmem:[%s1033_s2 + $0x68] sm:$0xff]  ;;  %v81_v14 = vld [vmem:[%s1033_s2 + $0x70] sm:$0xff] }
  0x16   :  { %78 = vst [vmem:[#allocation2 + $0x60] sm:$0xff] %v77_v12  ;;  %80 = vst [vmem:[#allocation2 + $0x68] sm:$0xff] %v79_v13 }
  0x17   :  { %82 = vst [vmem:[#allocation2 + $0x70] sm:$0xff] %v81_v14 }
  0x18   :  { %90 = vsyncadd [#allocation4], 1920 }
  0x19   :  { %549 = dma.done.wait [#allocation4], 1920 }
  0x1a   :  { %550 = vsyncadd [#allocation4], 4294965376  ;;  %v94_v15 = vld [vmem:[%s1032_s1] sm:$0xff]  ;;  %v95_v16 = vld [vmem:[%s1032_s1 + $0x8] sm:$0xff]  ;;  %s556_s2 = smov 127   ;;  %v557_v29 = vmov 0  }
  0x1b   :  { %v96_v17 = vfloor.f32 %v94_v15  ;;  %v97_v18 = vfloor.f32 %v95_v16  ;;  %s558_s1 = smov 126   ;;  %v1053_v51 = vmov 0  ;;  %v1055_v52 = vmov 0  ;;  %s941_s22 = smov 0  }
  0x1d   :  { %v633_v19 = vsub.f32 %v94_v15, %v96_v17  ;;  %v635_v20 = vsub.f32 %v95_v16, %v97_v18  ;;  %v513_v21 = vtrunc.f32 %v96_v17  ;;  %v515_v22 = vtrunc.f32 %v97_v18 }
  0x1f   :  { %v514_v23 = vcvt.f32.s32 %v513_v21  ;;  %v516_v24 = vcvt.f32.s32 %v515_v22  ;;  %198 = vrot.lane.b32.xlu1 %v633_v19, %s556_s2  ;;  %v640_v25 = vsub.f32 1.0, %v633_v19  ;;  %v643_v26 = vsub.f32 1.0, %v635_v20 }
  0x21   :  { %156 = vrot.lane.b32.xlu0 %v640_v25, %s556_s2  ;;  %vm107_vm0 = vcmp.ge.s32.totalorder %v516_v24, 0  ;;  %vm119_vm1 = vcmp.lt.s32.totalorder %v516_v24, 5  ;;  %vm106_vm2 = vcmp.ge.s32.totalorder %v514_v23, 0  ;;  %vm118_vm3 = vcmp.lt.s32.totalorder %v514_v23, 5 }
  0x22   :  { %vm121_vm4 = vmand %vm107_vm0, %vm119_vm1  ;;  %vm127_vm5 = vcmp.lt.s32.totalorder %v516_v24, 4  ;;  %v103_v27 = vadd.s32 1, %v516_v24  ;;  %v102_v28 = vadd.s32 1, %v514_v23  ;;  %vm126_vm7 = vcmp.lt.s32.totalorder %v514_v23, 4 }
  0x23   :  { %200 = vrot.lane.b32.xlu1 %v635_v20, %s556_s2  ;;  %vm120_vm6 = vmand %vm106_vm2, %vm118_vm3  ;;  %v135_v30 = vsel %vm121_vm4, 1, %v557_v29  ;;  %vm109_vm14 = vcmp.lt.s32.totalorder %v516_v24, 6  ;;  %vm108_vm4 = vcmp.lt.s32.totalorder %v514_v23, 6 }
  0x24   :  { %vm129_vm8 = vmand %vm107_vm0, %vm127_vm5  ;;  %vm113_vm9 = vcmp.ge.s32.totalorder %v103_v27, 0  ;;  %vm123_vm10 = vcmp.lt.s32.totalorder %v103_v27, 5  ;;  %v134_v31 = vsel %vm120_vm6, 1, %v557_v29  ;;  %vm112_vm11 = vcmp.ge.s32.totalorder %v102_v28, 0 }
  0x25   :  { %158 = vrot.lane.b32.xlu0 %v643_v26, %s556_s2  ;;  %vm122_vm12 = vcmp.lt.s32.totalorder %v102_v28, 5  ;;  %vm128_vm13 = vmand %vm106_vm2, %vm126_vm7  ;;  %v145_v32 = vsel %vm129_vm8, 1, %v557_v29  ;;  %vm115_vm1 = vcmp.lt.s32.totalorder %v103_v27, 6  ;;  %vm114_vm6 = vcmp.lt.s32.totalorder %v102_v28, 6 }
  0x26   :  { %vm125_vm15 = vmand %vm113_vm9, %vm123_vm10  ;;  %v144_v33 = vsel %vm128_vm13, 1, %v557_v29  ;;  %vm131_vm10 = vcmp.lt.s32.totalorder %v103_v27, 4 }
  0x27   :  { %138 = vrot.lane.b32.xlu1 %v135_v30, %s556_s2  ;;  %vm124_vm3 = vmand %vm112_vm11, %vm122_vm12  ;;  %v185_v36 = vsel %vm125_vm15, 1, %v557_v29  ;;  %vm130_vm12 = vcmp.lt.s32.totalorder %v102_v28, 4 }
  0x28   :  { %vm664_vm5 = vmand %vm107_vm0, %vm109_vm14  ;;  %v184_v39 = vsel %vm124_vm3, 1, %v557_v29 }
  0x29   :  { %136 = vrot.lane.b32.xlu0 %v134_v31, %s556_s2  ;;  %vm669_vm7 = vmand %vm113_vm9, %vm115_vm1 }
  0x2a   :  { %vm675_vm8 = vmand %vm106_vm2, %vm108_vm4 }
  0x2b   :  { %148 = vrot.lane.b32.xlu1 %v145_v32, %s558_s1  ;;  %vm680_vm0 = vmand %vm112_vm11, %vm114_vm6 }
  0x2c   :  { %vm133_vm13 = vmand %vm113_vm9, %vm131_vm10 }
  0x2d   :  { %146 = vrot.lane.b32.xlu0 %v144_v33, %s558_s1  ;;  %vm132_vm2 = vmand %vm112_vm11, %vm130_vm12  ;;  %v221_v40 = vsel %vm133_vm13, 1, %v557_v29 }
  0x2e   :  { %v220_v41 = vsel %vm132_vm2, 1, %v557_v29 }
  0x2f   :  { %188 = vrot.lane.b32.xlu1 %v185_v36, %s556_s2 }
  0x31   :  { %186 = vrot.lane.b32.xlu0 %v184_v39, %s556_s2 }
  0x33   :  { %166 = vrot.lane.b32.xlu1 %v643_v26, %s558_s1 }
  0x35   :  { %164 = vrot.lane.b32.xlu0 %v640_v25, %s558_s1 }
  0x37   :  { %224 = vrot.lane.b32.xlu1 %v221_v40, %s558_s1 }
  0x39   :  { %222 = vrot.lane.b32.xlu0 %v220_v41, %s558_s1 }
  0x3b   :  { %232 = vrot.lane.b32.xlu1 %v635_v20, %s558_s1 }
  0x3d   :  { %230 = vrot.lane.b32.xlu0 %v633_v19, %s558_s1 }
  0x91   :  { %v199_v42 = vpop.permute.xlu1 %198 }
  0x92   :  { %v204_v9 = vmul.f32 %v199_v42, %v640_v25  ;;  %v214_v10 = vmul.f32 %v199_v42, %v633_v19 }
  0x93   :  { %v157_v43 = vpop.permute.xlu0 %156 }
  0x94   :  { %v162_v11 = vmul.f32 %v157_v43, %v640_v25  ;;  %v178_v12 = vmul.f32 %v157_v43, %v633_v19 }
  0x95   :  { %v201_v44 = vpop.permute.xlu1 %200 }
  0x96   :  { %v205_v59 = vmul.f32 %v201_v44, %v643_v26  ;;  %v215_v62 = vmul.f32 %v201_v44, %v635_v20 }
  0x97   :  { %v159_v45 = vpop.permute.xlu0 %158 }
  0x98   :  { %v163_v63 = vmul.f32 %v159_v45, %v643_v26  ;;  %v179_v0 = vmul.f32 %v159_v45, %v635_v20 }
  0x99   :  { %v139_v46 = vpop.permute.xlu1 %138 }
  0x9a   :  { %vm141_vm9 = vcmp.ne.s32.totalorder %v139_v46, 0 }
  0x9b   :  { %v137_v47 = vpop.permute.xlu0 %136  ;;  %vm697_vm11 = vmand %vm664_vm5, %vm141_vm9 }
  0x9c   :  { %vm140_vm14 = vcmp.ne.s32.totalorder %v137_v47, 0  ;;  %vm703_vm15 = vmand %vm669_vm7, %vm141_vm9 }
  0x9d   :  { %v149_v50 = vpop.permute.xlu1 %148  ;;  %vm709_vm1 = vmand %vm675_vm8, %vm140_vm14 }
  0x9e   :  { %v1054_v51 = vsel %vm709_vm1, 4294967295, %v1053_v51  ;;  %vm151_vm3 = vcmp.ne.s32.totalorder %v149_v50, 0  ;;  %vm715_vm4 = vmand %vm680_vm0, %vm140_vm14 }
  0x9f   :  { %v1056_v52 = vsel %vm715_vm4, 4294967295, %v1055_v52  ;;  %v147_v53 = vpop.permute.xlu0 %146  ;;  %vm722_vm6 = vmand %vm697_vm11, %vm151_vm3 }
  0xa0   :  { %vm1035_vm10 = vcmp.ne.s32.totalorder %v147_v53, 0  ;;  %vm729_vm12 = vmand %vm703_vm15, %vm151_vm3 }
  0xa1   :  { %v189_v56 = vpop.permute.xlu1 %188  ;;  %vm736_vm13 = vmand %vm709_vm1, %vm1035_vm10 }
  0xa2   :  { %vm743_vm2 = vmand %vm715_vm4, %vm1035_vm10  ;;  %vm191_vm9 = vcmp.ne.s32.totalorder %v189_v56, 0 }
  0xa3   :  { %vm750_vm14 = vmand %vm664_vm5, %vm191_vm9  ;;  %v187_v61 = vpop.permute.xlu0 %186 }
  0xa4   :  { %vm760_vm10 = vmand %vm750_vm14, %vm151_vm3  ;;  %vm190_vm4 = vcmp.ne.s32.totalorder %v187_v61, 0 }
  0xa5   :  { %vm766_vm5 = vmand %vm669_vm7, %vm191_vm9  ;;  %v167_v3 = vpop.permute.xlu1 %166 }
  0xa6   :  { %vm773_vm1 = vmand %vm766_vm5, %vm151_vm3  ;;  %v777_v5 = vmul.f32 %v167_v3, %v163_v63  ;;  %v779_v6 = vmul.f32 %v179_v0, %v167_v3  ;;  %v781_v7 = vmul.f32 %v205_v59, %v167_v3  ;;  %v783_v8 = vmul.f32 %v215_v62, %v167_v3 }
  0xa7   :  { %vm792_vm7 = vmand %vm675_vm8, %vm190_vm4  ;;  %v165_v14 = vpop.permute.xlu0 %164  ;;  %vm1075_vm3 = vcmp.ne.s32.totalorder %v147_v53, 0 }
  0xa8   :  { %vm799_vm9 = vmand %vm792_vm7, %vm1075_vm3  ;;  %v173_v16 = vsel %vm722_vm6, %v777_v5, 0.0  ;;  %v183_v17 = vsel %vm729_vm12, %v779_v6, 0.0  ;;  %v209_v18 = vsel %vm760_vm10, %v781_v7, 0.0  ;;  %v219_v19 = vsel %vm773_vm1, %v783_v8, 0.0 }
  0xa9   :  { %vm818_vm8 = vmand %vm680_vm0, %vm190_vm4  ;;  %v822_v21 = vmul.f32 %v165_v14, %v162_v11  ;;  %v824_v22 = vmul.f32 %v178_v12, %v165_v14  ;;  %v826_v23 = vmul.f32 %v204_v9, %v165_v14  ;;  %v828_v24 = vmul.f32 %v214_v10, %v165_v14  ;;  %v225_v25 = vpop.permute.xlu1 %224 }
  0xaa   :  { %vm833_vm1 = vmand %vm818_vm8, %vm1075_vm3  ;;  %vm227_vm0 = vcmp.ne.s32.totalorder %v225_v25, 0 }
  0xab   :  { %v172_v27 = vsel %vm736_vm13, %v822_v21, 0.0  ;;  %v182_v28 = vsel %vm743_vm2, %v824_v22, 0.0  ;;  %v208_v30 = vsel %vm799_vm9, %v826_v23, 0.0  ;;  %v218_v31 = vsel %vm833_vm1, %v828_v24, 0.0  ;;  %vm851_vm4 = vmand %vm697_vm11, %vm227_vm0  ;;  %v223_v33 = vpop.permute.xlu0 %222 }
  0xac   :  { %vm857_vm3 = vmand %vm703_vm15, %vm227_vm0  ;;  %vm226_vm10 = vcmp.ne.s32.totalorder %v223_v33, 0  ;;  %vm1090_vm15 = vnez %v1054_v51 }
  0xad   :  { %vm863_vm9 = vmand %vm750_vm14, %vm227_vm0  ;;  %v233_v36 = vpop.permute.xlu1 %232 }
  0xae   :  { %vm869_vm11 = vmand %vm766_vm5, %vm227_vm0  ;;  %v873_v38 = vmul.f32 %v233_v36, %v163_v63  ;;  %v875_v39 = vmul.f32 %v233_v36, %v179_v0  ;;  %v877_v40 = vmul.f32 %v233_v36, %v205_v59  ;;  %v879_v41 = vmul.f32 %v233_v36, %v215_v62 }
  0xaf   :  { %vm884_vm14 = vmand %vm1090_vm15, %vm226_vm10  ;;  %v231_v43 = vpop.permute.xlu0 %230  ;;  %vm1093_vm5 = vnez %v1056_v52 }
  0xb0   :  { %vm891_vm0 = vmand %vm1093_vm5, %vm226_vm10  ;;  %v239_v45 = vsel %vm851_vm4, %v873_v38, 0.0  ;;  %v245_v46 = vsel %vm857_vm3, %v875_v39, 0.0  ;;  %v251_v47 = vsel %vm863_vm9, %v877_v40, 0.0  ;;  %v257_v48 = vsel %vm869_vm11, %v879_v41, 0.0 }
  0xb1   :  { %vm910_vm15 = vmand %vm792_vm7, %vm226_vm10  ;;  %v914_v50 = vmul.f32 %v231_v43, %v162_v11  ;;  %v916_v51 = vmul.f32 %v231_v43, %v178_v12  ;;  %v918_v52 = vmul.f32 %v231_v43, %v204_v9  ;;  %v920_v53 = vmul.f32 %v231_v43, %v214_v10 }
  0xb2   :  { %vm925_vm5 = vmand %vm818_vm8, %vm226_vm10 }
  0xb3   :  { %v238_v59 = vsel %vm884_vm14, %v914_v50, 0.0  ;;  %v244_v60 = vsel %vm891_vm0, %v916_v51, 0.0  ;;  %v250_v61 = vsel %vm910_vm15, %v918_v52, 0.0  ;;  %v256_v62 = vsel %vm925_vm5, %v920_v53, 0.0 }
  0xb4 LB: > { %s504_s23 = sshll.u32 %s553_s22, 3  ;;  %vm271_vm10 = vcmask 24576   ;;  %s270_s12 = scalar_lea.vmem [#allocation3], %s553_s22  ;;  %s553_s22 = sphi %s941_s22, %s264_s22  }
  0xb5   : > { %s267_s24 = sld [smem:[#allocation6 + %s504_s23]]  ;;  %s273_s25 = sadd.s32 1, %s504_s23 }
  0xb6   : > { %s274_s26 = sld [smem:[#allocation6 + %s273_s25]]  ;;  %s280_s27 = sadd.s32 2, %s504_s23 }
  0xb7   : > { %s281_s28 = sld [smem:[#allocation6 + %s280_s27]]  ;;  %s287_s29 = sadd.s32 3, %s504_s23 }
  0xb8   : > { %s288_s30 = sld [smem:[#allocation6 + %s287_s29]]  ;;  %s294_s4 = sadd.s32 4, %s504_s23 }
  0xb9   : > { %s295_s5 = sld [smem:[#allocation6 + %s294_s4]]  ;;  %s301_s6 = sadd.s32 5, %s504_s23 }
  0xba   : > { %s302_s7 = sld [smem:[#allocation6 + %s301_s6]]  ;;  %s308_s8 = sadd.s32 6, %s504_s23 }
  0xbb   : > { %s309_s9 = sld [smem:[#allocation6 + %s308_s8]]  ;;  %s268_s10 = scalar_lea.vmem [#allocation2], %s267_s24 }
  0xbc   : > { %v269_v63 = vld [vmem:[%s268_s10] sm:$0x1]  ;;  %s315_s11 = sadd.s32 7, %s504_s23  ;;  %s275_s13 = scalar_lea.vmem [#allocation2], %s274_s26 }
  0xbd   : > { %272 = vst.msk [vmem:[%s270_s12] sm:$0x1] %vm271_vm10, %v269_v63  ;;  %v276_v0 = vld [vmem:[%s275_s13] sm:$0x1]  ;;  %s316_s14 = sld [smem:[#allocation6 + %s315_s11]]  ;;  %s282_s15 = scalar_lea.vmem [#allocation2], %s281_s28 }
  0xbe   : > { %505 = vst.msk [vmem:[%s270_s12 + $0x10] sm:$0x1] %vm271_vm10, %v276_v0  ;;  %v283_v2 = vld [vmem:[%s282_s15] sm:$0x1]  ;;  %s289_s16 = scalar_lea.vmem [#allocation2], %s288_s30  ;;  %s264_s22 = sadd.s32 1, %s553_s22  }
  0xbf   : > { %506 = vst.msk [vmem:[%s270_s12 + $0x20] sm:$0x1] %vm271_vm10, %v283_v2  ;;  %v290_v3 = vld [vmem:[%s289_s16] sm:$0x1]  ;;  %s296_s17 = scalar_lea.vmem [#allocation2], %s295_s5  ;;  %p261_p5 = scmp.ge.s32.totalorder %s264_s22, 16  }
  0xc0   : > { %507 = vst.msk [vmem:[%s270_s12 + $0x30] sm:$0x1] %vm271_vm10, %v290_v3  ;;  %v297_v9 = vld [vmem:[%s296_s17] sm:$0x1]  ;;  %s303_s18 = scalar_lea.vmem [#allocation2], %s302_s7  ;;  %530 = vset.pattern.permute.xlu1 (%p261_p5), %v557_v29  ;;  %529 = vset.pattern.permute.xlu0 (%p261_p5), %v557_v29  ;;  %vm455_vm1 = vcmask (%p261_p5), 31744  }
  0xc1   : > { %508 = vst.msk [vmem:[%s270_s12 + $0x40] sm:$0x1] %vm271_vm10, %v297_v9  ;;  %v304_v10 = vld [vmem:[%s303_s18] sm:$0x1]  ;;  %s310_s19 = scalar_lea.vmem [#allocation2], %s309_s9  ;;  %263 = sbr.rel (!%p261_p5) target bundleno = 180 (0xb4), region = 100  ;;  %341 = vperm.xlu1 (%p261_p5), %530, %v182_v28   ;;  %326 = vperm.xlu0 (%p261_p5), %529, %v172_v27  }
  0xc2   : > { %509 = vst.msk [vmem:[%s270_s12 + $0x50] sm:$0x1] %vm271_vm10, %v304_v10  ;;  %v311_v11 = vld [vmem:[%s310_s19] sm:$0x1] }
  0xc3   : > { %510 = vst.msk [vmem:[%s270_s12 + $0x60] sm:$0x1] %vm271_vm10, %v311_v11  ;;  %s317_s20 = scalar_lea.vmem [#allocation2], %s316_s14 }
  0xc4   : > { %v318_v12 = vld [vmem:[%s317_s20] sm:$0x1] }
  0xc5   : > { %511 = vst.msk [vmem:[%s270_s12 + $0x70] sm:$0x1] %vm271_vm10, %v318_v12  ;;  %346 = vperm.xlu1 (%p261_p5), %530, %v183_v17   ;;  %331 = vperm.xlu0 (%p261_p5), %529, %v173_v16  }
  0xc9   :  { %363 = vperm.xlu1 %530, %v209_v18   ;;  %358 = vperm.xlu0 %529, %v208_v30  }
  0xcc   :  { %v337_v4 = vld [vmem:[#allocation3 + $0x10] sm:$0xff]  ;;  %v322_v5 = vld [vmem:[#allocation3] sm:$0xff]  ;;  %v338_v6 = vld [vmem:[#allocation3 + $0x18] sm:$0xff] }
  0xcd   :  { %380 = vperm.xlu1 %530, %v219_v19   ;;  %375 = vperm.xlu0 %529, %v218_v31   ;;  %v323_v7 = vld [vmem:[#allocation3 + $0x8] sm:$0xff]  ;;  %v354_v15 = vld [vmem:[#allocation3 + $0x20] sm:$0xff]  ;;  %v372_v20 = vld [vmem:[#allocation3 + $0x38] sm:$0xff] }
  0xce   :  { %v355_v14 = vld [vmem:[#allocation3 + $0x28] sm:$0xff]  ;;  %v371_v21 = vld [vmem:[#allocation3 + $0x30] sm:$0xff]  ;;  %v388_v27 = vld [vmem:[#allocation3 + $0x40] sm:$0xff] }
  0xcf   :  { %v389_v26 = vld [vmem:[#allocation3 + $0x48] sm:$0xff]  ;;  %v406_v34 = vld [vmem:[#allocation3 + $0x58] sm:$0xff]  ;;  %v405_v36 = vld [vmem:[#allocation3 + $0x50] sm:$0xff] }
  0xd0   :  { %v423_v41 = vld [vmem:[#allocation3 + $0x68] sm:$0xff]  ;;  %v422_v42 = vld [vmem:[#allocation3 + $0x60] sm:$0xff]  ;;  %v440_v53 = vld [vmem:[#allocation3 + $0x78] sm:$0xff] }
  0xd1   :  { %397 = vperm.xlu1 %530, %v239_v45   ;;  %392 = vperm.xlu0 %529, %v238_v59   ;;  %v439_v56 = vld [vmem:[#allocation3 + $0x70] sm:$0xff] }
  0xd5   :  { %414 = vperm.xlu1 %530, %v245_v46   ;;  %409 = vperm.xlu0 %529, %v244_v60  }
  0xd9   :  { %431 = vperm.xlu1 %530, %v251_v47   ;;  %426 = vperm.xlu0 %529, %v250_v61  }
  0xdd   :  { %448 = vperm.xlu1 %530, %v257_v48   ;;  %443 = vperm.xlu0 %529, %v256_v62  }
 0x13c   :  { %v342_v29 = vpop.permute.xlu1 %341  ;;  %v327_v54 = vpop.permute.xlu0 %326 }
 0x13d   :  { %v349_v16 = vmul.f32 %v342_v29, %v337_v4  ;;  %v334_v17 = vmul.f32 %v327_v54, %v322_v5 }
 0x13f   :  { %v351_v28 = vadd.f32 %v349_v16, %v334_v17 }
 0x140   :  { %v347_v55 = vpop.permute.xlu1 %346  ;;  %v332_v57 = vpop.permute.xlu0 %331 }
 0x141   :  { %v350_v18 = vmul.f32 %v347_v55, %v338_v6  ;;  %v335_v19 = vmul.f32 %v332_v57, %v323_v7 }
 0x143   :  { %v352_v30 = vadd.f32 %v350_v18, %v335_v19 }
 0x144   :  { %v364_v58 = vpop.permute.xlu1 %363  ;;  %v359_v1 = vpop.permute.xlu0 %358 }
 0x145   :  { %v367_v24 = vmul.f32 %v364_v58, %v355_v14  ;;  %v366_v25 = vmul.f32 %v359_v1, %v354_v15 }
 0x147   :  { %v369_v37 = vadd.f32 %v367_v24, %v352_v30  ;;  %v368_v38 = vadd.f32 %v366_v25, %v351_v28 }
 0x148   :  { %v381_v8 = vpop.permute.xlu1 %380  ;;  %v376_v13 = vpop.permute.xlu0 %375 }
 0x149   :  { %v384_v31 = vmul.f32 %v381_v8, %v372_v20  ;;  %v383_v32 = vmul.f32 %v376_v13, %v371_v21 }
 0x14b   :  { %v386_v43 = vadd.f32 %v384_v31, %v369_v37  ;;  %v385_v44 = vadd.f32 %v383_v32, %v368_v38 }
 0x14c   :  { %v398_v22 = vpop.permute.xlu1 %397  ;;  %v393_v23 = vpop.permute.xlu0 %392 }
 0x14d   :  { %v401_v39 = vmul.f32 %v398_v22, %v389_v26  ;;  %v400_v40 = vmul.f32 %v393_v23, %v388_v27 }
 0x14f   :  { %v403_v49 = vadd.f32 %v401_v39, %v386_v43  ;;  %v402_v50 = vadd.f32 %v400_v40, %v385_v44 }
 0x150   :  { %v415_v33 = vpop.permute.xlu1 %414  ;;  %v410_v35 = vpop.permute.xlu0 %409 }
 0x151   :  { %v418_v45 = vmul.f32 %v415_v33, %v406_v34  ;;  %v417_v46 = vmul.f32 %v410_v35, %v405_v36 }
 0x153   :  { %v420_v59 = vadd.f32 %v418_v45, %v403_v49  ;;  %v419_v60 = vadd.f32 %v417_v46, %v402_v50 }
 0x154   :  { %v432_v47 = vpop.permute.xlu1 %431  ;;  %v427_v48 = vpop.permute.xlu0 %426 }
 0x155   :  { %v435_v51 = vmul.f32 %v432_v47, %v423_v41  ;;  %v434_v52 = vmul.f32 %v427_v48, %v422_v42 }
 0x157   :  { %v437_v63 = vadd.f32 %v435_v51, %v420_v59  ;;  %v436_v0 = vadd.f32 %v434_v52, %v419_v60 }
 0x158   :  { %v449_v61 = vpop.permute.xlu1 %448  ;;  %v444_v62 = vpop.permute.xlu0 %443 }
 0x159   :  { %v452_v2 = vmul.f32 %v449_v61, %v440_v53  ;;  %v451_v3 = vmul.f32 %v444_v62, %v439_v56 }
 0x15b   :  { %v454_v9 = vadd.f32 %v452_v2, %v437_v63  ;;  %v453_v10 = vadd.f32 %v451_v3, %v436_v0 }
 0x15d   :  { %457 = vst.msk [vmem:[%s1034_s3 + $0x8] sm:$0xff] %vm455_vm1, %v454_v9  ;;  %456 = vst.msk [vmem:[%s1034_s3] sm:$0xff] %vm455_vm1, %v453_v10 }
 0x15e   :  { %462 = vsyncmov [#allocation4] }
 0x161   :  { %s463_s22 = vpop.sfrf %462 }
 0x162   :  { %p512_p6 = scmp.ne.s32.totalorder %s463_s22, 0 }
 0x164   :  { %467 = shalt.err (%p512_p6)  }

</bundles_post_ra>
